<compile_context>
chip_gen: v6e
topology: v6e:2x2x1
jax: 0.10.0
libtpu: 0.0.40
codegen_flags: <defaults>
</compile_context>

<pallas_src>
import jax
import jax.numpy as jnp
from jax.experimental import pallas as pl
from jax.experimental.pallas import tpu as pltpu


# Conservative budgets so the resident-table strategy is safe across
# v5e / v6e (128 MiB VMEM) and v7x (64 MiB physical VMEM per TC).
_VMEM_TABLE_BUDGET = 12 * 1024 * 1024   # max padded-table bytes kept resident
_ONEHOT_BUDGET = 4 * 1024 * 1024        # max bytes for the (TN, Vp) one-hot tile
_MAX_TN = 512                           # max tokens per grid step


def _round_up(x, m):
    return ((x + m - 1) // m) * m


def _embedding_gather_kernel(ids_ref, table_ref, out_ref):
    """Gather TN rows of the VMEM-resident table via a one-hot MXU matmul.

    ids_ref:   (TN, 1)  int32  token ids for this tile (column vector)
    table_ref: (Vp, Dp) full embedding table, resident in VMEM
    out_ref:   (TN, Dp) gathered rows (lane-dense, sublane-full tile)
    """
    ids = ids_ref[...]                                    # (TN, 1)
    tn = out_ref.shape[0]
    vp = table_ref.shape[0]
    col = jax.lax.broadcasted_iota(jnp.int32, (tn, vp), 1)
    one_hot = (col == ids).astype(table_ref.dtype)        # (TN, Vp)
    # One-hot row selection: exact (coefficients are 0/1, f32 accumulation).
    out_ref[...] = jnp.dot(
        one_hot, table_ref[...], preferred_element_type=jnp.float32
    ).astype(out_ref.dtype)


def embedding_lookup(table, ids):
    """Flat (EmbeddingProcessType.FLAT) embedding lookup: out[n] = table[ids[n]]."""
    V, D = table.shape
    # Clamp ids so a bad id can never select out of range.
    flat_ids = jnp.clip(ids.reshape(-1).astype(jnp.int32), 0, V - 1)
    N = flat_ids.shape[0]

    # Pad vocab / dim up to lane-friendly multiples of 128 (zeros are inert:
    # clamped ids never select a padded row, padded columns are sliced off).
    Vp = _round_up(V, 128)
    Dp = _round_up(D, 128)
    if (Vp, Dp) != (V, D):
        table_p = jnp.zeros((Vp, Dp), table.dtype).at[:V, :D].set(table)
    else:
        table_p = table

    itemsize = table.dtype.itemsize
    table_bytes = Vp * Dp * itemsize
    if table_bytes > _VMEM_TABLE_BUDGET:
        # TODO(synk): large-vocab path should use a batched manual-DMA gather
        # (memory_space=pl.ANY table + make_async_copy, several DMAs in flight);
        # fall back to the XLA gather here rather than fake it.
        return jnp.take(table, flat_ids, axis=0).reshape(ids.shape + (D,))

    # Tokens per grid step: sublane-full (multiple of 8), capped so the
    # (TN, Vp) one-hot intermediate stays within budget, and never larger
    # than the (padded) token count.
    tn = min(_MAX_TN, max(8, (_ONEHOT_BUDGET // (Vp * 4)) // 8 * 8))
    tn = min(tn, _round_up(N, 8))
    n_pad = _round_up(N, tn)

    # Ids as a column vector so the in-kernel broadcast against the lane-iota
    # needs no lane<->sublane relayout. Padding rows get id 0 (sliced off).
    ids_col = jnp.zeros((n_pad, 1), jnp.int32).at[:N, 0].set(flat_ids)

    grid = (n_pad // tn,)

    # Explicit VMEM budget: table (assume double-buffered by the pipeline even
    # though its block index is constant) + double-buffered out/id tiles +
    # one-hot & f32 matmul intermediates + headroom. Cap below v7x physical.
    vmem_bytes = (
        2 * table_bytes
        + 2 * tn * Dp * itemsize
        + 2 * tn * 128 * 4
        + tn * Vp * 4
        + tn * Dp * 4
        + (2 << 20)
    )
    vmem_limit = int(min(max(vmem_bytes, 16 * 1024 * 1024), 48 * 1024 * 1024))

    out = pl.pallas_call(
        _embedding_gather_kernel,
        out_shape=jax.ShapeDtypeStruct((n_pad, Dp), table.dtype),
        grid_spec=pltpu.PrefetchScalarGridSpec(
            num_scalar_prefetch=0,
            grid=grid,
            in_specs=[
                pl.BlockSpec((tn, 1), lambda i: (i, 0)),    # token ids (column)
                pl.BlockSpec((Vp, Dp), lambda i: (0, 0)),   # resident table
            ],
            out_specs=pl.BlockSpec((tn, Dp), lambda i: (i, 0)),
        ),
        compiler_params=pltpu.CompilerParams(
            dimension_semantics=("parallel",),   # independent tiles -> both TCs on v7x
            vmem_limit_bytes=vmem_limit,
        ),
    )(ids_col, table_p)

    return out[:N, :D].reshape(ids.shape + (D,))


def get_embedding(token_table, token_id, token_len, token_mask,
                  pad_shape=None, pad_value=0):
    """Mirrors Classifier.get_embedding (dropout = identity in eval mode)."""
    if pad_shape is not None:
        # torch.nn.functional.pad convention on the last dim: (left, right)
        left, right = pad_shape
        token_id = jnp.pad(token_id, ((0, 0), (left, right)),
                           constant_values=pad_value)
    embedding = embedding_lookup(token_table, token_id)
    return embedding, token_len, token_mask


def init_embedding_table(key, vocab_size, dim, padding_idx, bound=0.1):
    """Deterministic uniform init (config.embedding.initializer='uniform'),
    with the VOCAB_PADDING row zeroed (padding-idx semantics)."""
    tbl = jax.random.uniform(key, (vocab_size, dim), jnp.float32, -bound, bound)
    return tbl.at[padding_idx].set(0.0)


if __name__ == "__main__":
    key = jax.random.PRNGKey(0)
    B, S = 2, 8           # batch, sequence length
    V, D = 64, 128        # vocab size, config.embedding.dimension
    VOCAB_PADDING = 0

    k_tok, k_char, k_ids, k_odd = jax.random.split(key, 4)
    token_table = init_embedding_table(k_tok, V, D, VOCAB_PADDING)
    char_table = init_embedding_table(k_char, V, D, VOCAB_PADDING)

    token_id = jax.random.randint(k_ids, (B, S), 1, V, dtype=jnp.int32)
    token_mask = (token_id != VOCAB_PADDING).astype(jnp.float32)
    token_len = token_mask.sum(axis=-1).astype(jnp.int32)

    # get_embedding with an explicit pad_shape (pad 2 PAD tokens on the right)
    emb, length, mask = get_embedding(
        token_table, token_id, token_len, token_mask,
        pad_shape=(0, 2), pad_value=VOCAB_PADDING)
    jax.block_until_ready(emb)

    padded_ids = jnp.pad(token_id, ((0, 0), (0, 2)),
                         constant_values=VOCAB_PADDING)
    ref = token_table[padded_ids]
    assert emb.shape == (B, S + 2, D)
    assert jnp.allclose(emb, ref), "token embedding mismatch"

    # exercise the char-embedding path with the same kernel
    char_emb = embedding_lookup(char_table, token_id)
    jax.block_until_ready(char_emb)
    assert jnp.allclose(char_emb, char_table[token_id]), "char embedding mismatch"

    # non-128-multiple vocab / dim exercises the pad-and-slice path
    V2, D2 = 50, 96
    odd_table = init_embedding_table(k_odd, V2, D2, VOCAB_PADDING)
    odd_ids = jax.random.randint(k_ids, (3, 5), 0, V2, dtype=jnp.int32)
    odd_emb = embedding_lookup(odd_table, odd_ids)
    jax.block_until_ready(odd_emb)
    assert odd_emb.shape == (3, 5, D2)
    assert jnp.allclose(odd_emb, odd_table[odd_ids]), "odd-shape embedding mismatch"

    print("KERNEL_OK")
</pallas_src>

<mosaic_0001>
module attributes {stable_mosaic.version = 11 : i64} {
  func.func @_embedding_gather_kernel(%arg0: i32, %arg1: memref<24x1xi32, #tpu.memory_space<vmem>>, %arg2: memref<128x128xf32, #tpu.memory_space<vmem>>, %arg3: memref<24x128xf32, #tpu.memory_space<vmem>>) attributes {dimension_semantics = [#tpu.dimension_semantics<parallel>], iteration_bounds = array<i64: 1>, scalar_prefetch = 0 : i64, scratch_operands = 0 : i64, tpu.core_type = #tpu.core_type<tc>, window_params = [{transform_indices = @transform_0, window_bounds = array<i64: 24, 1>}, {pipeline_mode = #tpu.pipeline_mode<synchronous>, transform_indices = @transform_1, window_bounds = array<i64: 128, 128>}, {transform_indices = @transform_2, window_bounds = array<i64: 24, 128>}]} {
    %c0 = arith.constant 0 : index
    %c0_0 = arith.constant 0 : index
    %0 = vector.load %arg1[%c0, %c0_0] : memref<24x1xi32, #tpu.memory_space<vmem>>, vector<24x1xi32>
    %1 = tpu.iota {dimensions = array<i32: 1>} : vector<24x128xi32>
    %2 = vector.broadcast %0 : vector<24x1xi32> to vector<24x128xi32>
    %3 = arith.cmpi eq, %1, %2 : vector<24x128xi32>
    %4 = arith.extui %3 : vector<24x128xi1> to vector<24x128xi32>
    %5 = arith.sitofp %4 : vector<24x128xi32> to vector<24x128xf32>
    %c0_1 = arith.constant 0 : index
    %c0_2 = arith.constant 0 : index
    %6 = vector.load %arg2[%c0_1, %c0_2] : memref<128x128xf32, #tpu.memory_space<vmem>>, vector<128x128xf32>
    %cst = arith.constant dense<0.000000e+00> : vector<24x128xf32>
    %7 = tpu.matmul %5, %6, %cst {dimension_numbers = #tpu.dot_dimension_numbers<[1], [0], [0], [1], [0, 0, 1, 1], [], []>} : vector<24x128xf32>, vector<128x128xf32>, vector<24x128xf32> -> vector<24x128xf32>
    %c0_3 = arith.constant 0 : index
    %c0_4 = arith.constant 0 : index
    %8 = vector.load %arg3[%c0_3, %c0_4] : memref<24x128xf32, #tpu.memory_space<vmem>>, vector<24x128xf32>
    tpu.vector_store %arg3[%c0_3, %c0_4], %7 {strides = array<i32>} : memref<24x128xf32, #tpu.memory_space<vmem>>, vector<24x128xf32>,
    return
  }
  func.func @transform_0(%arg0: i32) -> (i32, i32) {
    %c0_i32 = arith.constant 0 : i32
    %c0_i32_0 = arith.constant 0 : i32
    return %arg0, %c0_i32 : i32, i32
  }
  func.func @transform_1(%arg0: i32) -> (i32, i32) {
    %c0_i32 = arith.constant 0 : i32
    %c0_i32_0 = arith.constant 0 : i32
    %c0_i32_1 = arith.constant 0 : i32
    return %c0_i32, %c0_i32_0 : i32, i32
  }
  func.func @transform_2(%arg0: i32) -> (i32, i32) {
    %c0_i32 = arith.constant 0 : i32
    %c0_i32_0 = arith.constant 0 : i32
    return %arg0, %c0_i32 : i32, i32
  }
}

</mosaic_0001>

<bundles_post_ra>
// kernel: tpu_custom_call.1
= control target key start
LH: loop header
LB: loop body
LE: loop exit
PB: predicated region body
PF: predicated region fallthrough
CT: control target
= control target key end

     0   :  { %7 = vsyncpa [#allocation3], 0  ;;  %s399_s0 = inlined_call_operand.vmem [shape: s32[24,1], index: 0, kind: input, shape index: {}]   ;;  %s400_s1 = inlined_call_operand.hbm [shape: f32[128,128], index: 1, kind: input, shape index: {}]   ;;  %s401_s2 = inlined_call_operand.hbm [shape: f32[24,128], index: 2, kind: output, shape index: {}]  }
   0x1   :  { %8 = vsyncpa [#allocation4], 0  ;;  %s317_s9 = smov [#allocation2]  }
   0x2   :  { %s16_s10 = sshll.u32 %s317_s9, 4  ;;  %s17_s10 = int_to_ptr.vmem [resolvable:$true] %s16_s10 }
   0x3   :  { %s281_s11 = scalar_lea.vmem %s17_s10, 2048  ;;  %p286_p1 = scmp.lt.s32.totalorder %s17_s10, %s17_s10 }
   0x4   :  { %p282_p0 = scmp.ne.s32.totalorder %s17_s10, %s281_s11  ;;  %p287_p2 = scmp.lt.s32.totalorder %s281_s11, %s281_s11 }
   0x6   :  { %p288_p3 = por %p287_p2, %p286_p1 }
   0x8   :  { %p289_p4 = pnand %p288_p3, %p282_p0 }
   0xa   :  { %292 = shalt.err (!%p289_p4)
}
   0xb   :  { %s318_s12 = smov 128   ;;  %s319_s13 = smov 8  }
   0xc   :  { %22 = dma.hbm_to_vmem [thread:$0]  %s400_s1, 2048, %s17_s10, [#allocation3], %s318_s12, %s318_s12, %s319_s13  }
   0xd   :  { %313 = dma.done.wait [#allocation3], 2048  }
   0xe   :  { %314 = vsyncadd [#allocation3], 4294965248  ;;  %v320_v0 = vmov 0   ;;  %v321_v1 = vmov 0.0   ;;  %vm322_vm0 = vmmov 0   ;;  %v27_v2 = vld [vmem:[%s399_s0 + $0x8] sm:$0xff]  ;;  %v29_v21 = vlaneseq }
   0xf   :  { %271 = vset.pattern.permute.xlu0 %v320_v0  ;;  %272 = vset.pattern.permute.xlu1 %v320_v0  ;;  %v28_v3 = vld [vmem:[%s399_s0 + $0x10] sm:$0xff]  ;;  %v64_v4 = vld [vmem:[#allocation2 + $0x78] sm:$0xff]  ;;  %v26_v6 = vld [vmem:[%s399_s0] sm:$0xff]  ;;  %v323_v25 = vmov 1.0   ;;  %s324_s0 = smov [#allocation5]  }
  0x10   :  { %231 = vmatprep.subr.mxu1 %v321_v1  ;;  %190 = vmatprep.subr.mxu0 %v321_v1  ;;  %v63_v5 = vld [vmem:[#allocation2 + $0x70] sm:$0xff]  ;;  %v62_v7 = vld [vmem:[#allocation2 + $0x68] sm:$0xff]  ;;  %v61_v8 = vld [vmem:[#allocation2 + $0x60] sm:$0xff]  ;;  %v30_v22 = vand.u32 127, %v29_v21  ;;  %s153_s21 = sshll.u32 %s324_s0, 4  ;;  %s154_s21 = int_to_ptr.vmem [resolvable:$true] %s153_s21 }
  0x11   :  { %225 = vmatprep.mubr.msk.f32.mxu1 %vm322_vm0, %v321_v1  ;;  %222 = vmatprep.mubr.msk.f32.mxu0 %vm322_vm0, %v321_v1  ;;  %v60_v9 = vld [vmem:[#allocation2 + $0x58] sm:$0xff]  ;;  %v59_v10 = vld [vmem:[#allocation2 + $0x50] sm:$0xff]  ;;  %v58_v11 = vld [vmem:[#allocation2 + $0x48] sm:$0xff]  ;;  %s293_s22 = scalar_lea.vmem %s154_s21, 384  ;;  %p298_p6 = scmp.lt.s32.totalorder %s154_s21, %s154_s21 }
  0x12   :  { %35 = vperm.xlu0 %271, %v27_v2   ;;  %38 = vperm.xlu1 %272, %v28_v3   ;;  %v57_v12 = vld [vmem:[#allocation2 + $0x40] sm:$0xff]  ;;  %v56_v13 = vld [vmem:[#allocation2 + $0x38] sm:$0xff]  ;;  %v55_v14 = vld [vmem:[#allocation2 + $0x30] sm:$0xff]  ;;  %p294_p5 = scmp.ne.s32.totalorder %s154_s21, %s293_s22  ;;  %p299_p7 = scmp.lt.s32.totalorder %s293_s22, %s293_s22 }
  0x13   :  { %247 = vmatpush3.msra.mxu1 %v64_v4  ;;  %191 = vmatpush3.msra.mxu0 %v64_v4  ;;  %v54_v15 = vld [vmem:[#allocation2 + $0x28] sm:$0xff]  ;;  %v53_v16 = vld [vmem:[#allocation2 + $0x20] sm:$0xff]  ;;  %v52_v17 = vld [vmem:[#allocation2 + $0x18] sm:$0xff] }
  0x14   :  { %232 = vmatprep.subr.mxu1 %v321_v1  ;;  %192 = vmatprep.subr.mxu0 %v321_v1  ;;  %v51_v18 = vld [vmem:[#allocation2 + $0x10] sm:$0xff]  ;;  %v50_v19 = vld [vmem:[#allocation2 + $0x8] sm:$0xff]  ;;  %v49_v20 = vld [vmem:[#allocation2] sm:$0xff]  ;;  %p300_p8 = por %p299_p7, %p298_p6 }
  0x15   :  { %248 = vmatpush3.msra.mxu1 %v63_v5  ;;  %193 = vmatpush3.msra.mxu0 %v63_v5 }
  0x16   :  { %32 = vperm.xlu0 %271, %v26_v6   ;;  %233 = vmatprep.subr.mxu1 %v321_v1  ;;  %p301_p9 = pnand %p300_p8, %p294_p5 }
  0x17   :  { %249 = vmatpush3.msra.mxu1 %v62_v7  ;;  %194 = vmatprep.subr.mxu0 %v321_v1 }
  0x18   :  { %234 = vmatprep.subr.mxu1 %v321_v1  ;;  %195 = vmatpush3.msra.mxu0 %v62_v7 }
  0x19   :  { %250 = vmatpush3.msra.mxu1 %v61_v8  ;;  %196 = vmatprep.subr.mxu0 %v321_v1 }
  0x1a   :  { %235 = vmatprep.subr.mxu1 %v321_v1  ;;  %197 = vmatpush3.msra.mxu0 %v61_v8 }
  0x1b   :  { %251 = vmatpush3.msra.mxu1 %v60_v9  ;;  %198 = vmatprep.subr.mxu0 %v321_v1 }
  0x1c   :  { %236 = vmatprep.subr.mxu1 %v321_v1  ;;  %199 = vmatpush3.msra.mxu0 %v60_v9 }
  0x1d   :  { %252 = vmatpush3.msra.mxu1 %v59_v10  ;;  %200 = vmatprep.subr.mxu0 %v321_v1 }
  0x1e   :  { %237 = vmatprep.subr.mxu1 %v321_v1  ;;  %201 = vmatpush3.msra.mxu0 %v59_v10 }
  0x1f   :  { %253 = vmatpush3.msra.mxu1 %v58_v11  ;;  %202 = vmatprep.subr.mxu0 %v321_v1 }
  0x20   :  { %238 = vmatprep.subr.mxu1 %v321_v1  ;;  %203 = vmatpush3.msra.mxu0 %v58_v11 }
  0x21   :  { %254 = vmatpush3.msra.mxu1 %v57_v12  ;;  %204 = vmatprep.subr.mxu0 %v321_v1 }
  0x22   :  { %239 = vmatprep.subr.mxu1 %v321_v1  ;;  %205 = vmatpush3.msra.mxu0 %v57_v12 }
  0x23   :  { %255 = vmatpush3.msra.mxu1 %v56_v13  ;;  %206 = vmatprep.subr.mxu0 %v321_v1 }
  0x24   :  { %240 = vmatprep.subr.mxu1 %v321_v1  ;;  %207 = vmatpush3.msra.mxu0 %v56_v13 }
  0x25   :  { %256 = vmatpush3.msra.mxu1 %v55_v14  ;;  %208 = vmatprep.subr.mxu0 %v321_v1 }
  0x26   :  { %241 = vmatprep.subr.mxu1 %v321_v1  ;;  %209 = vmatpush3.msra.mxu0 %v55_v14 }
  0x27   :  { %257 = vmatpush3.msra.mxu1 %v54_v15  ;;  %210 = vmatprep.subr.mxu0 %v321_v1 }
  0x28   :  { %242 = vmatprep.subr.mxu1 %v321_v1  ;;  %211 = vmatpush3.msra.mxu0 %v54_v15 }
  0x29   :  { %258 = vmatpush3.msra.mxu1 %v53_v16  ;;  %212 = vmatprep.subr.mxu0 %v321_v1 }
  0x2a   :  { %243 = vmatprep.subr.mxu1 %v321_v1  ;;  %213 = vmatpush3.msra.mxu0 %v53_v16 }
  0x2b   :  { %259 = vmatpush3.msra.mxu1 %v52_v17  ;;  %214 = vmatprep.subr.mxu0 %v321_v1 }
  0x2c   :  { %244 = vmatprep.subr.mxu1 %v321_v1  ;;  %215 = vmatpush3.msra.mxu0 %v52_v17 }
  0x2d   :  { %260 = vmatpush3.msra.mxu1 %v51_v18  ;;  %216 = vmatprep.subr.mxu0 %v321_v1 }
  0x2e   :  { %245 = vmatprep.subr.mxu1 %v321_v1  ;;  %217 = vmatpush3.msra.mxu0 %v51_v18 }
  0x2f   :  { %261 = vmatpush3.msra.mxu1 %v50_v19  ;;  %218 = vmatprep.subr.mxu0 %v321_v1 }
  0x30   :  { %246 = vmatprep.subr.mxu1 %v321_v1  ;;  %219 = vmatpush3.msra.mxu0 %v50_v19 }
  0x31   :  { %262 = vmatpush3.msra.mxu1 %v49_v20  ;;  %220 = vmatprep.subr.mxu0 %v321_v1 }
  0x32   :  { %221 = vmatpush3.msra.mxu0 %v49_v20 }
  0x8d   :  { %v36_v23 = vpop.permute.xlu0 %35  ;;  %v39_v24 = vpop.permute.xlu1 %38 }
  0x8e   :  { %vm41_vm1 = vcmp.eq.s32.totalorder %v30_v22, %v36_v23  ;;  %vm42_vm2 = vcmp.eq.s32.totalorder %v30_v22, %v39_v24 }
  0x8f   :  { %226 = vmatmul.mubr.msk.f32.vlgmr.msra.gmra.mxu1 %vm41_vm1, %v323_v25 }
  0x90   :  { %228 = vmatprep.mubr.msk.f32.mxu1 %vm322_vm0, %v321_v1 }
  0x91   :  { %v33_v26 = vpop.permute.xlu0 %32 }
  0x92   :  { %vm40_vm3 = vcmp.eq.s32.totalorder %v30_v22, %v33_v26 }
  0x93   :  { %223 = vmatmul.mubr.msk.f32.vlgmr.msra.gmra.mxu0 %vm40_vm3, %v323_v25  ;;  %229 = vmatmul.mubr.msk.f32.gmra.mxu1 %vm42_vm2, %v323_v25 }
 0x14f   :  { %v136_v27 = vpop.f32.mrf.mxu1 }
 0x150   :  { %146 = vst [vmem:[#allocation5 + $0x8] sm:$0xff] %v136_v27 }
 0x151   :  { %v227_v28 = vpop.f32.mrf.mxu1 }
 0x153   :  { %v131_v29 = vpop.f32.mrf.mxu0  ;;  %v141_v30 = vpop.f32.mrf.mxu1 }
 0x154   :  { %145 = vst [vmem:[#allocation5] sm:$0xff] %v131_v29  ;;  %147 = vst [vmem:[#allocation5 + $0x10] sm:$0xff] %v141_v30 }
 0x155   :  { %v224_v31 = vpop.f32.mrf.mxu0  ;;  %v230_v32 = vpop.f32.mrf.mxu1 }
 0x156   :  { %304 = shalt.err (!%p301_p9)
}
 0x157   :  { %159 = dma.vmem_to_hbm [thread:$0]  %s154_s21, 384, %s401_s2, [#allocation4], %s318_s12, %s318_s12, %s319_s13  }
 0x158   :  { %315 = dma.done.wait [#allocation4], 384  }
 0x159   :  { %316 = vsyncadd [#allocation4], 4294966912 }
 0x15a   :  { %163 = vsyncpa [#allocation3], 1 }
 0x15b   :  { %164 = vsyncpa [#allocation4], 1 }

</bundles_post_ra>
